<compile_context>
chip_gen: v6e
topology: v6e:2x2x1
jax: 0.10.0
libtpu: 0.0.40
codegen_flags: <defaults>
</compile_context>

<pallas_src>
import functools
import math

import jax
import jax.numpy as jnp
from jax.experimental import pallas as pl
from jax.experimental.pallas import tpu as pltpu

# ---- model config (small, consistent with BertConfig semantics) -------------
BATCH = 2
SEQ = 8
HIDDEN = 32
NUM_HEADS = 4
HEAD_DIM = HIDDEN // NUM_HEADS
LAYER_NORM_EPS = 1e-12


# ---- Pallas kernel -----------------------------------------------------------
def _bert_attention_kernel(
    x_ref,        # (N, H)   N = B*S flattened tokens
    mask_ref,     # (N, N)   combined additive mask (key padding + cross-example)
    wqkv_ref,     # (H, 3H)  fused [Wq | Wk | Wv], stored (in, out)
    bqkv_ref,     # (1, 3H)
    wo_ref,       # (H, H)
    bo_ref,       # (1, H)
    gamma_ref,    # (1, H)   LayerNorm gamma
    beta_ref,     # (1, H)   LayerNorm beta
    out_ref,      # (N, H)
    ctx_ref,      # scratch: (N, H) f32 context accumulator
    *, num_heads, head_dim, hidden, eps,
):
    x = x_ref[...]  # (N, H) float32

    # Fused QKV projection: one MXU pass over the (H, 3H) packed weight.
    qkv = (jnp.dot(x, wqkv_ref[...], preferred_element_type=jnp.float32)
           + bqkv_ref[...])                                        # (N, 3H)

    # Head-batched (num_heads, N, head_dim) layout via leading-axis stack
    # (leading-dim concat: no lane/sublane relayout of the pieces).
    def split_heads(base):
        return jnp.stack(
            [qkv[:, base + h * head_dim: base + (h + 1) * head_dim]
             for h in range(num_heads)],
            axis=0)

    q = split_heads(0)              # (nh, N, d)
    k = split_heads(hidden)         # (nh, N, d)
    v = split_heads(2 * hidden)     # (nh, N, d)

    # Scaled dot-product attention for all heads in one batched dot.
    scores = jnp.einsum("hqd,hkd->hqk", q, k,
                        preferred_element_type=jnp.float32)        # (nh, N, N)
    scores = scores * (1.0 / math.sqrt(head_dim)) + mask_ref[...][None, :, :]

    # Numerically stable softmax over the (flattened) key axis.  Cross-example
    # and padded keys carry a huge negative additive mask, so exp() gives an
    # exact 0 for them and the result equals the per-example softmax.
    scores = scores - jnp.max(scores, axis=-1, keepdims=True)
    p = jnp.exp(scores)
    p = p * pl.reciprocal(jnp.sum(p, axis=-1, keepdims=True), approx=True)

    ctx = jnp.einsum("hqk,hkd->hqd", p, v,
                     preferred_element_type=jnp.float32)           # (nh, N, d)

    # Scatter heads into the (N, H) context accumulator (no lane concatenate).
    for h in range(num_heads):
        ctx_ref[:, h * head_dim:(h + 1) * head_dim] = ctx[h]

    # BertSelfOutput: dense -> (+ residual) -> LayerNorm.
    proj = (jnp.dot(ctx_ref[...], wo_ref[...],
                    preferred_element_type=jnp.float32) + bo_ref[...])
    resid = proj + x
    mu = jnp.mean(resid, axis=-1, keepdims=True)
    var = jnp.mean((resid - mu) ** 2, axis=-1, keepdims=True)
    out = (resid - mu) * jax.lax.rsqrt(var + eps) * gamma_ref[...] + beta_ref[...]
    out_ref[...] = out.astype(out_ref.dtype)


# ---- wrapper -----------------------------------------------------------------
def bert_attention(hidden_states, attention_mask, params):
    B, S, H = hidden_states.shape
    N = B * S

    # --- wrapper-side layout plumbing (pure reshapes / tiny host-side math) --
    x2d = hidden_states.reshape(N, H)

    # Combined additive mask over the flattened token axis:
    #   same-example pairs  -> the user's BERT key mask value (0 / -10000)
    #   cross-example pairs -> -1e9 (their softmax contribution underflows to 0)
    key_mask = attention_mask.reshape(B, S).astype(jnp.float32)
    ex_ids = jnp.repeat(jnp.arange(B), S)                     # (N,)
    same = ex_ids[:, None] == ex_ids[None, :]                 # (N, N)
    mask_nn = jnp.where(same, key_mask.reshape(1, N), -1e9)   # (N, N)

    # Fused QKV weight / bias (weights already stored as (in, out)).
    w_qkv = jnp.concatenate([params["wq"], params["wk"], params["wv"]], axis=1)
    b_qkv = jnp.concatenate(
        [params["bq"], params["bk"], params["bv"]]).reshape(1, 3 * H)

    kernel = functools.partial(
        _bert_attention_kernel,
        num_heads=NUM_HEADS, head_dim=HEAD_DIM, hidden=H, eps=LAYER_NORM_EPS)

    # Single invocation: no grid, every operand lives whole in VMEM.
    out2d = pl.pallas_call(
        kernel,
        out_shape=jax.ShapeDtypeStruct((N, H), hidden_states.dtype),
        scratch_shapes=[pltpu.VMEM((N, H), jnp.float32)],
    )(
        x2d, mask_nn,
        w_qkv, b_qkv,
        params["wo"], params["bo"].reshape(1, H),
        params["ln_gamma"].reshape(1, H), params["ln_beta"].reshape(1, H),
    )
    return out2d.reshape(B, S, H)


# ---- pure-JAX reference (for correctness check) ------------------------------
def bert_attention_ref(x, mask, p):
    B, S, H = x.shape
    q = x @ p["wq"] + p["bq"]
    k = x @ p["wk"] + p["bk"]
    v = x @ p["wv"] + p["bv"]

    def split(t):  # (B,S,H) -> (B,nh,S,d)
        return t.reshape(B, S, NUM_HEADS, HEAD_DIM).transpose(0, 2, 1, 3)

    qh, kh, vh = split(q), split(k), split(v)
    scores = jnp.einsum("bhqd,bhkd->bhqk", qh, kh) / math.sqrt(HEAD_DIM)
    scores = scores + mask  # (B,1,1,S) broadcast
    probs = jax.nn.softmax(scores, axis=-1)
    ctx = jnp.einsum("bhqk,bhkd->bhqd", probs, vh)
    ctx = ctx.transpose(0, 2, 1, 3).reshape(B, S, H)

    proj = ctx @ p["wo"] + p["bo"]
    resid = proj + x
    mu = jnp.mean(resid, axis=-1, keepdims=True)
    var = jnp.mean((resid - mu) ** 2, axis=-1, keepdims=True)
    return ((resid - mu) * jax.lax.rsqrt(var + LAYER_NORM_EPS)
            * p["ln_gamma"] + p["ln_beta"])


# ---- deterministic parameter / input construction ----------------------------
def make_params(key):
    keys = jax.random.split(key, 8)
    scale = 0.02

    def lin(kw):  # weight stored as (in, out) for x @ W + b
        return scale * jax.random.normal(kw, (HIDDEN, HIDDEN), jnp.float32)

    return {
        "wq": lin(keys[0]),
        "bq": scale * jax.random.normal(keys[1], (HIDDEN,), jnp.float32),
        "wk": lin(keys[2]), "bk": jnp.zeros((HIDDEN,), jnp.float32),
        "wv": lin(keys[3]),
        "bv": scale * jax.random.normal(keys[4], (HIDDEN,), jnp.float32),
        "wo": lin(keys[5]),
        "bo": scale * jax.random.normal(keys[6], (HIDDEN,), jnp.float32),
        "ln_gamma": jnp.ones((HIDDEN,), jnp.float32),
        "ln_beta": jnp.zeros((HIDDEN,), jnp.float32),
    }


if __name__ == "__main__":
    root = jax.random.PRNGKey(0)
    k_x, k_p, k_m = jax.random.split(root, 3)

    x = jax.random.normal(k_x, (BATCH, SEQ, HIDDEN), jnp.float32)
    params = make_params(k_p)

    # Standard BERT additive mask: 0 for attended positions, -10000 for padded.
    valid = (jax.random.uniform(k_m, (BATCH, SEQ)) > 0.2).astype(jnp.float32)
    valid = valid.at[:, 0].set(1.0)  # keep at least one valid token per row
    attn_mask = ((1.0 - valid) * -10000.0)[:, None, None, :]  # (B,1,1,S)

    out = bert_attention(x, attn_mask, params)
    out = jax.block_until_ready(out)

    ref = bert_attention_ref(x, attn_mask, params)
    assert out.shape == (BATCH, SEQ, HIDDEN)
    # 2e-3 tolerance covers the EUP approximate-reciprocal used in the softmax.
    assert jnp.allclose(out, ref, atol=2e-3, rtol=2e-3), (
        f"max abs err {jnp.max(jnp.abs(out - ref))}")

    print("KERNEL_OK")
</pallas_src>

<mosaic_0001>
module attributes {stable_mosaic.version = 11 : i64} {
  func.func @_bert_attention_kernel(%arg0: memref<16x32xf32, #tpu.memory_space<vmem>>, %arg1: memref<16x16xf32, #tpu.memory_space<vmem>>, %arg2: memref<32x96xf32, #tpu.memory_space<vmem>>, %arg3: memref<1x96xf32, #tpu.memory_space<vmem>>, %arg4: memref<32x32xf32, #tpu.memory_space<vmem>>, %arg5: memref<1x32xf32, #tpu.memory_space<vmem>>, %arg6: memref<1x32xf32, #tpu.memory_space<vmem>>, %arg7: memref<1x32xf32, #tpu.memory_space<vmem>>, %arg8: memref<16x32xf32, #tpu.memory_space<vmem>>, %arg9: memref<16x32xf32, #tpu.memory_space<vmem>>) attributes {dimension_semantics = [], scalar_prefetch = 0 : i64, scratch_operands = 1 : i64, tpu.core_type = #tpu.core_type<tc>} {
    %c0 = arith.constant 0 : index
    %c0_0 = arith.constant 0 : index
    %0 = vector.load %arg0[%c0, %c0_0] : memref<16x32xf32, #tpu.memory_space<vmem>>, vector<16x32xf32>
    %c0_1 = arith.constant 0 : index
    %c0_2 = arith.constant 0 : index
    %1 = vector.load %arg2[%c0_1, %c0_2] : memref<32x96xf32, #tpu.memory_space<vmem>>, vector<32x96xf32>
    %cst = arith.constant dense<0.000000e+00> : vector<16x96xf32>
    %2 = tpu.matmul %0, %1, %cst {dimension_numbers = #tpu.dot_dimension_numbers<[1], [0], [0], [1], [0, 0, 1, 1], [], []>} : vector<16x32xf32>, vector<32x96xf32>, vector<16x96xf32> -> vector<16x96xf32>
    %c0_3 = arith.constant 0 : index
    %c0_4 = arith.constant 0 : index
    %3 = vector.load %arg3[%c0_3, %c0_4] : memref<1x96xf32, #tpu.memory_space<vmem>>, vector<1x96xf32>
    %4 = vector.broadcast %3 : vector<1x96xf32> to vector<16x96xf32>
    %5 = arith.addf %2, %4 : vector<16x96xf32>
    %6 = vector.extract_strided_slice %5 {offsets = [0, 0], sizes = [16, 8], strides = [1, 1]} : vector<16x96xf32> to vector<16x8xf32>
    %7 = vector.extract_strided_slice %5 {offsets = [0, 8], sizes = [16, 8], strides = [1, 1]} : vector<16x96xf32> to vector<16x8xf32>
    %8 = vector.extract_strided_slice %5 {offsets = [0, 16], sizes = [16, 8], strides = [1, 1]} : vector<16x96xf32> to vector<16x8xf32>
    %9 = vector.extract_strided_slice %5 {offsets = [0, 24], sizes = [16, 8], strides = [1, 1]} : vector<16x96xf32> to vector<16x8xf32>
    %10 = vector.shape_cast %6 : vector<16x8xf32> to vector<1x16x8xf32>
    %11 = vector.shape_cast %7 : vector<16x8xf32> to vector<1x16x8xf32>
    %12 = vector.shape_cast %8 : vector<16x8xf32> to vector<1x16x8xf32>
    %13 = vector.shape_cast %9 : vector<16x8xf32> to vector<1x16x8xf32>
    %14 = tpu.concatenate %10, %11, %12, %13 in 0 : vector<1x16x8xf32>, vector<1x16x8xf32>, vector<1x16x8xf32>, vector<1x16x8xf32> -> vector<4x16x8xf32>
    %15 = vector.extract_strided_slice %5 {offsets = [0, 32], sizes = [16, 8], strides = [1, 1]} : vector<16x96xf32> to vector<16x8xf32>
    %16 = vector.extract_strided_slice %5 {offsets = [0, 40], sizes = [16, 8], strides = [1, 1]} : vector<16x96xf32> to vector<16x8xf32>
    %17 = vector.extract_strided_slice %5 {offsets = [0, 48], sizes = [16, 8], strides = [1, 1]} : vector<16x96xf32> to vector<16x8xf32>
    %18 = vector.extract_strided_slice %5 {offsets = [0, 56], sizes = [16, 8], strides = [1, 1]} : vector<16x96xf32> to vector<16x8xf32>
    %19 = vector.shape_cast %15 : vector<16x8xf32> to vector<1x16x8xf32>
    %20 = vector.shape_cast %16 : vector<16x8xf32> to vector<1x16x8xf32>
    %21 = vector.shape_cast %17 : vector<16x8xf32> to vector<1x16x8xf32>
    %22 = vector.shape_cast %18 : vector<16x8xf32> to vector<1x16x8xf32>
    %23 = tpu.concatenate %19, %20, %21, %22 in 0 : vector<1x16x8xf32>, vector<1x16x8xf32>, vector<1x16x8xf32>, vector<1x16x8xf32> -> vector<4x16x8xf32>
    %24 = vector.extract_strided_slice %5 {offsets = [0, 64], sizes = [16, 8], strides = [1, 1]} : vector<16x96xf32> to vector<16x8xf32>
    %25 = vector.extract_strided_slice %5 {offsets = [0, 72], sizes = [16, 8], strides = [1, 1]} : vector<16x96xf32> to vector<16x8xf32>
    %26 = vector.extract_strided_slice %5 {offsets = [0, 80], sizes = [16, 8], strides = [1, 1]} : vector<16x96xf32> to vector<16x8xf32>
    %27 = vector.extract_strided_slice %5 {offsets = [0, 88], sizes = [16, 8], strides = [1, 1]} : vector<16x96xf32> to vector<16x8xf32>
    %28 = vector.shape_cast %24 : vector<16x8xf32> to vector<1x16x8xf32>
    %29 = vector.shape_cast %25 : vector<16x8xf32> to vector<1x16x8xf32>
    %30 = vector.shape_cast %26 : vector<16x8xf32> to vector<1x16x8xf32>
    %31 = vector.shape_cast %27 : vector<16x8xf32> to vector<1x16x8xf32>
    %32 = tpu.concatenate %28, %29, %30, %31 in 0 : vector<1x16x8xf32>, vector<1x16x8xf32>, vector<1x16x8xf32>, vector<1x16x8xf32> -> vector<4x16x8xf32>
    "tpu.trace_start"() <{level = 10 : i32, message = "hqd,hkd->hqk"}> : () -> ()
    %cst_5 = arith.constant dense<0.000000e+00> : vector<4x16x16xf32>
    %33 = tpu.matmul %14, %23, %cst_5 {dimension_numbers = #tpu.dot_dimension_numbers<[2], [2], [1], [1], [0, 0, 0, 1, 1, 1], [0], [0]>} : vector<4x16x8xf32>, vector<4x16x8xf32>, vector<4x16x16xf32> -> vector<4x16x16xf32>
    "tpu.trace_stop"() : () -> ()
    %cst_6 = arith.constant 0.353553385 : f32
    %34 = vector.broadcast %cst_6 : f32 to vector<4x16x16xf32>
    %35 = arith.mulf %33, %34 : vector<4x16x16xf32>
    %c0_7 = arith.constant 0 : index
    %c0_8 = arith.constant 0 : index
    %36 = vector.load %arg1[%c0_7, %c0_8] : memref<16x16xf32, #tpu.memory_space<vmem>>, vector<16x16xf32>
    %37 = vector.shape_cast %36 : vector<16x16xf32> to vector<1x16x16xf32>
    %38 = vector.broadcast %37 : vector<1x16x16xf32> to vector<4x16x16xf32>
    %39 = arith.addf %35, %38 : vector<4x16x16xf32>
    %cst_9 = arith.constant dense<0xFF800000> : vector<4x16xf32>
    %40 = vector.multi_reduction <maximumf>, %39, %cst_9 [2] : vector<4x16x16xf32> to vector<4x16xf32>
    %41 = vector.shape_cast %40 : vector<4x16xf32> to vector<4x16x1xf32>
    %42 = vector.broadcast %41 : vector<4x16x1xf32> to vector<4x16x16xf32>
    %43 = arith.subf %39, %42 : vector<4x16x16xf32>
    %44 = math.exp %43 : vector<4x16x16xf32>
    %cst_10 = arith.constant dense<0.000000e+00> : vector<4x16xf32>
    %45 = vector.multi_reduction <add>, %44, %cst_10 [2] : vector<4x16x16xf32> to vector<4x16xf32>
    %46 = vector.shape_cast %45 : vector<4x16xf32> to vector<4x16x1xf32>
    %47 = tpu.reciprocal %46 {approx = true} : vector<4x16x1xf32> -> vector<4x16x1xf32>
    %48 = vector.broadcast %47 : vector<4x16x1xf32> to vector<4x16x16xf32>
    %49 = arith.mulf %44, %48 : vector<4x16x16xf32>
    "tpu.trace_start"() <{level = 10 : i32, message = "hqk,hkd->hqd"}> : () -> ()
    %cst_11 = arith.constant dense<0.000000e+00> : vector<4x16x8xf32>
    %50 = tpu.matmul %49, %32, %cst_11 {dimension_numbers = #tpu.dot_dimension_numbers<[2], [1], [1], [2], [0, 0, 0, 1, 1, 2], [0], [0]>} : vector<4x16x16xf32>, vector<4x16x8xf32>, vector<4x16x8xf32> -> vector<4x16x8xf32>
    "tpu.trace_stop"() : () -> ()
    %51 = vector.extract_strided_slice %50 {offsets = [0, 0, 0], sizes = [1, 16, 8], strides = [1, 1, 1]} : vector<4x16x8xf32> to vector<1x16x8xf32>
    %52 = vector.shape_cast %51 : vector<1x16x8xf32> to vector<16x8xf32>
    %c0_12 = arith.constant 0 : index
    %c0_13 = arith.constant 0 : index
    %53 = vector.load %arg9[%c0_12, %c0_13] : memref<16x32xf32, #tpu.memory_space<vmem>>, vector<16x8xf32>
    tpu.vector_store %arg9[%c0_12, %c0_13], %52 {strides = array<i32>} : memref<16x32xf32, #tpu.memory_space<vmem>>, vector<16x8xf32>,
    %54 = vector.extract_strided_slice %50 {offsets = [1, 0, 0], sizes = [1, 16, 8], strides = [1, 1, 1]} : vector<4x16x8xf32> to vector<1x16x8xf32>
    %55 = vector.shape_cast %54 : vector<1x16x8xf32> to vector<16x8xf32>
    %c0_14 = arith.constant 0 : index
    %c8 = arith.constant 8 : index
    %56 = vector.load %arg9[%c0_14, %c8] : memref<16x32xf32, #tpu.memory_space<vmem>>, vector<16x8xf32>
    tpu.vector_store %arg9[%c0_14, %c8], %55 {strides = array<i32>} : memref<16x32xf32, #tpu.memory_space<vmem>>, vector<16x8xf32>,
    %57 = vector.extract_strided_slice %50 {offsets = [2, 0, 0], sizes = [1, 16, 8], strides = [1, 1, 1]} : vector<4x16x8xf32> to vector<1x16x8xf32>
    %58 = vector.shape_cast %57 : vector<1x16x8xf32> to vector<16x8xf32>
    %c0_15 = arith.constant 0 : index
    %c16 = arith.constant 16 : index
    %59 = vector.load %arg9[%c0_15, %c16] : memref<16x32xf32, #tpu.memory_space<vmem>>, vector<16x8xf32>
    tpu.vector_store %arg9[%c0_15, %c16], %58 {strides = array<i32>} : memref<16x32xf32, #tpu.memory_space<vmem>>, vector<16x8xf32>,
    %60 = vector.extract_strided_slice %50 {offsets = [3, 0, 0], sizes = [1, 16, 8], strides = [1, 1, 1]} : vector<4x16x8xf32> to vector<1x16x8xf32>
    %61 = vector.shape_cast %60 : vector<1x16x8xf32> to vector<16x8xf32>
    %c0_16 = arith.constant 0 : index
    %c24 = arith.constant 24 : index
    %62 = vector.load %arg9[%c0_16, %c24] : memref<16x32xf32, #tpu.memory_space<vmem>>, vector<16x8xf32>
    tpu.vector_store %arg9[%c0_16, %c24], %61 {strides = array<i32>} : memref<16x32xf32, #tpu.memory_space<vmem>>, vector<16x8xf32>,
    %c0_17 = arith.constant 0 : index
    %c0_18 = arith.constant 0 : index
    %63 = vector.load %arg9[%c0_17, %c0_18] : memref<16x32xf32, #tpu.memory_space<vmem>>, vector<16x32xf32>
    %c0_19 = arith.constant 0 : index
    %c0_20 = arith.constant 0 : index
    %64 = vector.load %arg4[%c0_19, %c0_20] : memref<32x32xf32, #tpu.memory_space<vmem>>, vector<32x32xf32>
    %cst_21 = arith.constant dense<0.000000e+00> : vector<16x32xf32>
    %65 = tpu.matmul %63, %64, %cst_21 {dimension_numbers = #tpu.dot_dimension_numbers<[1], [0], [0], [1], [0, 0, 1, 1], [], []>} : vector<16x32xf32>, vector<32x32xf32>, vector<16x32xf32> -> vector<16x32xf32>
    %c0_22 = arith.constant 0 : index
    %c0_23 = arith.constant 0 : index
    %66 = vector.load %arg5[%c0_22, %c0_23] : memref<1x32xf32, #tpu.memory_space<vmem>>, vector<1x32xf32>
    %67 = vector.broadcast %66 : vector<1x32xf32> to vector<16x32xf32>
    %68 = arith.addf %65, %67 : vector<16x32xf32>
    %69 = arith.addf %68, %0 : vector<16x32xf32>
    %cst_24 = arith.constant dense<0.000000e+00> : vector<16xf32>
    %70 = vector.multi_reduction <add>, %69, %cst_24 [1] : vector<16x32xf32> to vector<16xf32>
    %71 = vector.shape_cast %70 : vector<16xf32> to vector<16x1xf32>
    %cst_25 = arith.constant 3.200000e+01 : f32
    %72 = vector.broadcast %cst_25 : f32 to vector<16x1xf32>
    %73 = arith.divf %71, %72 : vector<16x1xf32>
    %74 = vector.broadcast %73 : vector<16x1xf32> to vector<16x32xf32>
    %75 = arith.subf %69, %74 : vector<16x32xf32>
    %76 = arith.mulf %75, %75 : vector<16x32xf32>
    %cst_26 = arith.constant dense<0.000000e+00> : vector<16xf32>
    %77 = vector.multi_reduction <add>, %76, %cst_26 [1] : vector<16x32xf32> to vector<16xf32>
    %78 = vector.shape_cast %77 : vector<16xf32> to vector<16x1xf32>
    %cst_27 = arith.constant 3.200000e+01 : f32
    %79 = vector.broadcast %cst_27 : f32 to vector<16x1xf32>
    %80 = arith.divf %78, %79 : vector<16x1xf32>
    %81 = vector.broadcast %73 : vector<16x1xf32> to vector<16x32xf32>
    %82 = arith.subf %69, %81 : vector<16x32xf32>
    %cst_28 = arith.constant 9.99999996E-13 : f32
    %83 = vector.broadcast %cst_28 : f32 to vector<16x1xf32>
    %84 = arith.addf %80, %83 : vector<16x1xf32>
    %85 = math.rsqrt %84 : vector<16x1xf32>
    %86 = vector.broadcast %85 : vector<16x1xf32> to vector<16x32xf32>
    %87 = arith.mulf %82, %86 : vector<16x32xf32>
    %c0_29 = arith.constant 0 : index
    %c0_30 = arith.constant 0 : index
    %88 = vector.load %arg6[%c0_29, %c0_30] : memref<1x32xf32, #tpu.memory_space<vmem>>, vector<1x32xf32>
    %89 = vector.broadcast %88 : vector<1x32xf32> to vector<16x32xf32>
    %90 = arith.mulf %87, %89 : vector<16x32xf32>
    %c0_31 = arith.constant 0 : index
    %c0_32 = arith.constant 0 : index
    %91 = vector.load %arg7[%c0_31, %c0_32] : memref<1x32xf32, #tpu.memory_space<vmem>>, vector<1x32xf32>
    %92 = vector.broadcast %91 : vector<1x32xf32> to vector<16x32xf32>
    %93 = arith.addf %90, %92 : vector<16x32xf32>
    %c0_33 = arith.constant 0 : index
    %c0_34 = arith.constant 0 : index
    %94 = vector.load %arg8[%c0_33, %c0_34] : memref<16x32xf32, #tpu.memory_space<vmem>>, vector<16x32xf32>
    tpu.vector_store %arg8[%c0_33, %c0_34], %93 {strides = array<i32>} : memref<16x32xf32, #tpu.memory_space<vmem>>, vector<16x32xf32>,
    return
  }
}

</mosaic_0001>

<bundles_post_ra>
// kernel: tpu_custom_call.1
= control target key start
LH: loop header
LB: loop body
LE: loop exit
PB: predicated region body
PF: predicated region fallthrough
CT: control target
= control target key end

     0   :  { %13 = vsyncpa [#allocation4], 0  ;;  %s1740_s0 = inlined_call_operand.hbm [shape: f32[16,32], index: 0, kind: input, shape index: {}]   ;;  %s1741_s1 = inlined_call_operand.hbm [shape: f32[16,16], index: 1, kind: input, shape index: {}]   ;;  %s1742_s2 = inlined_call_operand.hbm [shape: f32[32,96], index: 2, kind: input, shape index: {}]   ;;  %s1743_s3 = inlined_call_operand.vmem [shape: f32[1,96], index: 3, kind: input, shape index: {}]   ;;  %s1744_s4 = inlined_call_operand.hbm [shape: f32[32,32], index: 4, kind: input, shape index: {}]   ;;  %s1745_s5 = inlined_call_operand.vmem [shape: f32[1,32], index: 5, kind: input, shape index: {}]   ;;  %s1746_s6 = inlined_call_operand.vmem [shape: f32[1,32], index: 6, kind: input, shape index: {}]   ;;  %s1747_s7 = inlined_call_operand.vmem [shape: f32[1,32], index: 7, kind: input, shape index: {}]   ;;  %s1748_s8 = inlined_call_operand.hbm [shape: f32[16,32], index: 8, kind: output, shape index: {}]  }
   0x1   :  { %14 = vsyncpa [#allocation7], 0 }
   0x2   :  { %15 = vsyncpa [#allocation10], 0 }
   0x3   :  { %16 = vsyncpa [#allocation5], 0  ;;  %s1507_s27 = smov [#allocation6]   ;;  %s1508_s29 = smov [#allocation3]  }
   0x4   :  { %s34_s28 = sshll.u32 %s1507_s27, 4  ;;  %s22_s30 = sshll.u32 %s1508_s29, 4  ;;  %s35_s28 = int_to_ptr.vmem [resolvable:$true] %s34_s28  ;;  %s23_s30 = int_to_ptr.vmem [resolvable:$true] %s22_s30 }
   0x5   :  { %s1407_s9 = scalar_lea.vmem %s35_s28, 256  ;;  %p1412_p1 = scmp.lt.s32.totalorder %s35_s28, %s35_s28 }
   0x6   :  { %p1408_p0 = scmp.ne.s32.totalorder %s35_s28, %s1407_s9  ;;  %p1413_p2 = scmp.lt.s32.totalorder %s1407_s9, %s1407_s9 }
   0x8   :  { %p1414_p3 = por %p1413_p2, %p1412_p1 }
   0xa   :  { %p1415_p4 = pnand %p1414_p3, %p1408_p0 }
   0xc   :  { %1418 = shalt.err (!%p1415_p4)
}
   0xd   :  { %s1509_s10 = smov 128   ;;  %s1510_s11 = smov 8  }
   0xe   :  { %40 = dma.hbm_to_vmem [thread:$0]  %s1741_s1, 256, %s35_s28, [#allocation7], %s1509_s10, %s1509_s10, %s1510_s11  }
   0xf   :  { %s1427_s14 = scalar_lea.vmem %s23_s30, 256  ;;  %p1432_p6 = scmp.lt.s32.totalorder %s23_s30, %s23_s30 }
  0x10   :  { %p1428_p5 = scmp.ne.s32.totalorder %s23_s30, %s1427_s14  ;;  %p1433_p7 = scmp.lt.s32.totalorder %s1427_s14, %s1427_s14 }
  0x12   :  { %p1434_p8 = por %p1433_p7, %p1432_p6 }
  0x14   :  { %p1435_p9 = pnand %p1434_p8, %p1428_p5 }
  0x16   :  { %1438 = shalt.err (!%p1435_p9)
}
  0x17   :  { %28 = dma.hbm_to_vmem [thread:$0]  %s1740_s0, 256, %s23_s30, [#allocation4], %s1509_s10, %s1509_s10, %s1510_s11  }
  0x18   :  { %s1511_s17 = smov [#allocation8]   ;;  %s1512_s19 = smov [#allocation9]  }
  0x19   :  { %s46_s18 = sshll.u32 %s1511_s17, 4  ;;  %s60_s20 = sshll.u32 %s1512_s19, 4  ;;  %s47_s18 = int_to_ptr.vmem [resolvable:$true] %s46_s18  ;;  %s61_s20 = int_to_ptr.vmem [resolvable:$true] %s60_s20 }
  0x1a   :  { %s1447_s1 = scalar_lea.vmem %s47_s18, 512  ;;  %p1452_p11 = scmp.lt.s32.totalorder %s47_s18, %s47_s18 }
  0x1b   :  { %p1448_p10 = scmp.ne.s32.totalorder %s47_s18, %s1447_s1  ;;  %p1453_p12 = scmp.lt.s32.totalorder %s1447_s1, %s1447_s1 }
  0x1d   :  { %p1454_p13 = por %p1453_p12, %p1452_p11 }
  0x1f   :  { %p1455_p0 = pnand %p1454_p13, %p1448_p10 }
  0x21   :  { %1458 = shalt.err (!%p1455_p0)
}
  0x22   :  { %52 = dma.hbm_to_vmem [thread:$0]  %s1742_s2, 512, %s47_s18, [#allocation7], %s1509_s10, %s1509_s10, %s1510_s11  }
  0x23   :  { %s1467_s0 = scalar_lea.vmem %s61_s20, 512  ;;  %p1472_p2 = scmp.lt.s32.totalorder %s61_s20, %s61_s20 }
  0x24   :  { %p1468_p1 = scmp.ne.s32.totalorder %s61_s20, %s1467_s0  ;;  %p1473_p3 = scmp.lt.s32.totalorder %s1467_s0, %s1467_s0 }
  0x26   :  { %p1474_p4 = por %p1473_p3, %p1472_p2 }
  0x28   :  { %p1475_p5 = pnand %p1474_p4, %p1468_p1 }
  0x2a   :  { %1478 = shalt.err (!%p1475_p5)
}
  0x2b   :  { %66 = dma.hbm_to_vmem [thread:$0]  %s1744_s4, 512, %s61_s20, [#allocation10], %s1509_s10, %s1509_s10, %s1510_s11  }
  0x2c   :  { %1499 = dma.done.wait [#allocation4], 256  }
  0x2d   :  { %1500 = vsyncadd [#allocation4], 4294967040 }
  0x2e   :  { %1501 = dma.done.wait [#allocation7], 768  }
  0x2f   :  { %1502 = vsyncadd [#allocation7], 4294966528 }
  0x30   :  { %1503 = dma.done.wait [#allocation10], 512  }
  0x31   :  { %1504 = vsyncadd [#allocation10], 4294966784  ;;  %vm98_vm0 = vcmask 261120   ;;  %v90_v0 = vld [vmem:[#allocation8 + $0x18] sm:$0xff]  ;;  %v89_v1 = vld [vmem:[#allocation8 + $0x10] sm:$0xff]  ;;  %vm198_vm1 = vcmask 64512  }
  0x32   :  { %1271 = vmatprep.subr.mxu0 %v90_v0  ;;  %v1590_v2 = vld [vmem:[#allocation3] sm:$0xff]  ;;  %v88_v3 = vld [vmem:[#allocation8 + $0x8] sm:$0xff]  ;;  %v1195_v6 = vld [vmem:[%s1743_s3] ss:$0 sm:$0xff]  ;;  %s1513_s25 = smov 112   ;;  %s1514_s26 = smov 120  }
  0x33   :  { %1272 = vmatpush3.msra.mxu0 %v90_v0  ;;  %1279 = vmatprep.mubr.msk.f32.mxu0 %vm98_vm0, %v1590_v2  ;;  %v87_v4 = vld [vmem:[#allocation8] sm:$0xff]  ;;  %v1594_v5 = vld [vmem:[#allocation3 + $0x8] sm:$0xff]  ;;  %s1515_s3 = smov 104   ;;  %s1516_s27 = smov 96   ;;  %v552_v26 = vld [vmem:[#allocation6 + $0x8] sm:$0xff]  ;;  %vm561_vm2 = vcmask 130048  }
  0x34   :  { %1273 = vmatprep.subr.mxu0 %v89_v1  ;;  %v551_v29 = vld [vmem:[#allocation6] sm:$0xff]  ;;  %s1517_s28 = smov 64   ;;  %s1518_s29 = smov 16   ;;  %vm1008_vm3 = vcmask 130112   ;;  %vm1019_vm4 = vcmask 195712   ;;  %vm1030_vm5 = vcmask 261312  }
  0x35   :  { %1274 = vmatpush3.msra.mxu0 %v89_v1  ;;  %s1519_s30 = smov 24   ;;  %s1520_s16 = smov [#allocation11]  }
  0x36   :  { %1275 = vmatprep.subr.mxu0 %v88_v3  ;;  %s1181_s17 = sshll.u32 %s1520_s16, 4  ;;  %s1182_s17 = int_to_ptr.vmem [resolvable:$true] %s1181_s17 }
  0x37   :  { %1276 = vmatpush3.msra.mxu0 %v88_v3  ;;  %s1479_s18 = scalar_lea.vmem %s1182_s17, 256  ;;  %p1484_p7 = scmp.lt.s32.totalorder %s1182_s17, %s1182_s17 }
  0x38   :  { %1277 = vmatprep.subr.mxu0 %v87_v4  ;;  %p1480_p6 = scmp.ne.s32.totalorder %s1182_s17, %s1479_s18  ;;  %p1485_p8 = scmp.lt.s32.totalorder %s1479_s18, %s1479_s18 }
  0x39   :  { %1278 = vmatpush3.msra.mxu0 %v87_v4 }
  0x3a   :  { %1280 = vmatmul.mubr.msk.f32.vlgmr.msra.gmra.mxu0 %vm98_vm0, %v1594_v5  ;;  %p1486_p9 = por %p1485_p8, %p1484_p7 }
  0x3c   :  { %p1487_p10 = pnand %p1486_p9, %p1480_p6 }
  0xfa   :  { %v1281_v7 = vpop.f32.mrf.mxu0 }
  0xfb   :  { %v1601_v8 = vadd.f32 %v1281_v7, %v1195_v6 }
  0xfc   :  { %v171_v9 = vpop.f32.mrf.mxu0 }
  0xfd   :  { %v1603_v10 = vadd.f32 %v1195_v6, %v171_v9  ;;  %188 = vrot.lane.b32.xlu1 %v1601_v8, %s1513_s25  ;;  %184 = vrot.lane.b32.xlu0 %v1601_v8, %s1514_s26 }
  0xff   :  { %1286 = vmatprep.mubr.msk.f32.mxu1 %vm198_vm1, %v1603_v10 }
 0x101   :  { %186 = vrot.lane.b32.xlu1 %v1603_v10, %s1513_s25  ;;  %182 = vrot.lane.b32.xlu0 %v1603_v10, %s1514_s26 }
 0x105   :  { %190 = vrot.lane.b32.xlu1 %v1603_v10, %s1515_s3  ;;  %192 = vrot.lane.b32.xlu0 %v1601_v8, %s1515_s3 }
 0x109   :  { %194 = vrot.lane.b32.xlu1 %v1603_v10, %s1516_s27  ;;  %196 = vrot.lane.b32.xlu0 %v1601_v8, %s1516_s27 }
 0x16f   :  { %v1615_v11 = vpop.permute.xlu1 %188  ;;  %v1617_v12 = vpop.permute.xlu0 %184 }
 0x170   :  { %284 = vrot.lane.b32.xlu0 %v1617_v12, %s1516_s27 }
 0x173   :  { %v1620_v13 = vpop.permute.xlu1 %186  ;;  %v1622_v14 = vpop.permute.xlu0 %182 }
 0x174   :  { %371 = vrot.lane.b32.xlu0 %v1615_v11, %s1516_s27  ;;  %1293 = vmatprep.mubr.msk.f32.mxu0 %vm198_vm1, %v1622_v14 }
 0x175   :  { %282 = vrot.lane.b32.xlu1 %v1622_v14, %s1516_s27 }
 0x177   :  { %v1628_v15 = vpop.permute.xlu1 %190  ;;  %v1630_v16 = vpop.permute.xlu0 %192 }
 0x178   :  { %458 = vrot.lane.b32.xlu0 %v1630_v16, %s1516_s27 }
 0x179   :  { %369 = vrot.lane.b32.xlu1 %v1620_v13, %s1516_s27 }
 0x17b   :  { %v197_v17 = vpop.permute.xlu0 %196  ;;  %v195_v18 = vpop.permute.xlu1 %194 }
 0x17c   :  { %1282 = vmatprep.subr.msk.mxu1 %vm198_vm1, %v197_v17 }
 0x17d   :  { %456 = vrot.lane.b32.xlu1 %v1628_v15, %s1516_s27  ;;  %1283 = vmatpush3.xpose.msk.msra.mxu1 %vm198_vm1, %v197_v17 }
 0x17e   :  { %1284 = vmatprep.subr.msk.mxu1 %vm198_vm1, %v195_v18 }
 0x181   :  { %1285 = vmatpush3.xpose.msk.msra.mxu1 %vm198_vm1, %v195_v18 }
 0x184   :  { %1287 = vmatmul.mubr.msk.f32.vlgmr.msra.gmra.mxu1 %vm198_vm1, %v1601_v8 }
 0x185   :  { %1300 = vmatprep.mubr.msk.f32.mxu1 %vm198_vm1, %v1620_v13 }
 0x1e2   :  { %v285_v19 = vpop.permute.xlu0 %284 }
 0x1e3   :  { %1289 = vmatprep.subr.msk.mxu0 %vm198_vm1, %v285_v19 }
 0x1e4   :  { %1290 = vmatpush3.xpose.msk.msra.mxu0 %vm198_vm1, %v285_v19 }
 0x1e6   :  { %v372_v20 = vpop.permute.xlu0 %371 }
 0x1e7   :  { %v283_v21 = vpop.permute.xlu1 %282  ;;  %1296 = vmatprep.subr.msk.mxu1 %vm198_vm1, %v372_v20 }
 0x1e8   :  { %1291 = vmatprep.subr.msk.mxu0 %vm198_vm1, %v283_v21  ;;  %1297 = vmatpush3.xpose.msk.msra.mxu1 %vm198_vm1, %v372_v20 }
 0x1e9   :  { %1292 = vmatpush3.xpose.msk.msra.mxu0 %vm198_vm1, %v283_v21 }
 0x1ea   :  { %v459_v22 = vpop.permute.xlu0 %458 }
 0x1eb   :  { %v370_v23 = vpop.permute.xlu1 %369  ;;  %1303 = vmatprep.subr.msk.mxu0 %vm198_vm1, %v459_v22 }
 0x1ec   :  { %1294 = vmatmul.mubr.msk.f32.vlgmr.msra.gmra.mxu0 %vm198_vm1, %v1617_v12  ;;  %1298 = vmatprep.subr.msk.mxu1 %vm198_vm1, %v370_v23 }
 0x1ed   :  { %1299 = vmatpush3.xpose.msk.msra.mxu1 %vm198_vm1, %v370_v23  ;;  %1304 = vmatpush3.xpose.msk.msra.mxu0 %vm198_vm1, %v459_v22 }
 0x1ee   :  { %1307 = vmatprep.mubr.msk.f32.mxu0 %vm198_vm1, %v1628_v15 }
 0x1ef   :  { %v457_v24 = vpop.permute.xlu1 %456 }
 0x1f0   :  { %1301 = vmatmul.mubr.msk.f32.vlgmr.msra.gmra.mxu1 %vm198_vm1, %v1615_v11  ;;  %1305 = vmatprep.subr.msk.mxu0 %vm198_vm1, %v457_v24 }
 0x1f1   :  { %1306 = vmatpush3.xpose.msk.msra.mxu0 %vm198_vm1, %v457_v24 }
 0x1f4   :  { %1308 = vmatmul.mubr.msk.f32.vlgmr.msra.gmra.mxu0 %vm198_vm1, %v1630_v16 }
 0x244   :  { %v1288_v25 = vpop.f32.mrf.mxu1 }
 0x245   :  { %v544_v27 = vmul.f32 0.35355338, %v1288_v25 }
 0x246   :  { %v273_v28 = vpop.f32.mrf.mxu1 }
 0x247   :  { %v543_v30 = vmul.f32 0.35355338, %v273_v28  ;;  %v554_v31 = vadd.f32 %v552_v26, %v544_v27 }
 0x249   :  { %v565_v32 = vsel %vm561_vm2, %v554_v31, -inf  ;;  %v553_v33 = vadd.f32 %v551_v29, %v543_v30 }
 0x24a   :  { %566 = vmax.xlane.f32.xlu1 %v565_v32 }
 0x24b   :  { %v562_v34 = vsel %vm561_vm2, %v553_v33, -inf }
 0x24c   :  { %563 = vmax.xlane.f32.xlu0 %v562_v34 }
 0x2ac   :  { %v1295_v35 = vpop.f32.mrf.mxu0 }
 0x2ad   :  { %v546_v36 = vmul.f32 0.35355338, %v1295_v35 }
 0x2ae   :  { %v360_v37 = vpop.f32.mrf.mxu0 }
 0x2af   :  { %v545_v38 = vmul.f32 0.35355338, %v360_v37  ;;  %v556_v42 = vadd.f32 %v552_v26, %v546_v36 }
 0x2b0   :  { %v1302_v39 = vpop.f32.mrf.mxu1 }
 0x2b1   :  { %v555_v40 = vadd.f32 %v551_v29, %v545_v38  ;;  %v548_v43 = vmul.f32 0.35355338, %v1302_v39  ;;  %v571_v49 = vsel %vm561_vm2, %v556_v42, -inf }
 0x2b2   :  { %v447_v41 = vpop.f32.mrf.mxu1 }
 0x2b3   :  { %v547_v44 = vmul.f32 0.35355338, %v447_v41  ;;  %v568_v45 = vsel %vm561_vm2, %v555_v40, -inf  ;;  %v558_v53 = vadd.f32 %v552_v26, %v548_v43 }
 0x2b4   :  { %v1309_v46 = vpop.f32.mrf.mxu0  ;;  %569 = vmax.xlane.f32.xlu0 %v568_v45 }
 0x2b5   :  { %v557_v47 = vadd.f32 %v551_v29, %v547_v44  ;;  %v550_v50 = vmul.f32 0.35355338, %v1309_v46  ;;  %v577_v55 = vsel %vm561_vm2, %v558_v53, -inf }
 0x2b6   :  { %v534_v48 = vpop.f32.mrf.mxu0 }
 0x2b7   :  { %v549_v51 = vmul.f32 0.35355338, %v534_v48  ;;  %v574_v52 = vsel %vm561_vm2, %v557_v47, -inf  ;;  %v560_v57 = vadd.f32 %v552_v26, %v550_v50 }
 0x2b8   :  { %572 = vmax.xlane.f32.xlu0 %v571_v49  ;;  %575 = vmax.xlane.f32.xlu1 %v574_v52 }
 0x2b9   :  { %v559_v54 = vadd.f32 %v551_v29, %v549_v51  ;;  %v583_v58 = vsel %vm561_vm2, %v560_v57, -inf }
 0x2bb   :  { %v580_v56 = vsel %vm561_vm2, %v559_v54, -inf }
 0x2bc   :  { %578 = vmax.xlane.f32.xlu0 %v577_v55  ;;  %581 = vmax.xlane.f32.xlu1 %v580_v56 }
 0x2c0   :  { %584 = vmax.xlane.f32.xlu0 %v583_v58 }
 0x2cd   :  { %652 = vrot.lane.b32.xlu1 %v1601_v8, %s1517_s28 }
 0x2d1   :  { %739 = vrot.lane.b32.xlu1 %v1617_v12, %s1517_s28 }
 0x2d3   :  { %v567_v59 = vpop.xlane.xlu1 %566 }
 0x2d4   :  { %v587_v60 = vsub.f32 %v554_v31, %v567_v59 }
 0x2d5   :  { %737 = vrot.lane.b32.xlu1 %v1622_v14, %s1517_s28  ;;  %v564_v61 = vpop.xlane.xlu0 %563 }
 0x2d6   :  { %650 = vrot.lane.b32.xlu0 %v1603_v10, %s1517_s28  ;;  %v596_v62 = vmul.f32 1.442695, %v587_v60  ;;  %v586_v63 = vsub.f32 %v553_v33, %v564_v61 }
 0x2d8   :  { %1363 = vpow2.f32 %v596_v62  ;;  %v594_v0 = vmul.f32 1.442695, %v586_v63 }
 0x2d9   :  { %824 = vrot.lane.b32.xlu1 %v1620_v13, %s1517_s28 }
 0x2da   :  { %826 = vrot.lane.b32.xlu0 %v1615_v11, %s1517_s28  ;;  %1365 = vpow2.f32 %v594_v0 }
 0x2e5   :  { %v1683_v1 = vpop.eup %1363 }
 0x2e6   :  { %v613_v3 = vsel %vm561_vm2, %v1683_v1, 0.0 }
 0x2e7   :  { %v1687_v4 = vpop.eup %1365 }
 0x2e8   :  { %v610_v6 = vsel %vm561_vm2, %v1687_v4, 0.0 }
 0x2f9   :  { %614 = vadd.xlane.f32.xlu0 %v613_v3 }
 0x2fd   :  { %611 = vadd.xlane.f32.xlu1 %v610_v6 }
 0x33d   :  { %v570_v7 = vpop.xlane.xlu0 %569 }
 0x33e   :  { %v588_v8 = vsub.f32 %v555_v40, %v570_v7 }
 0x340   :  { %v598_v9 = vmul.f32 1.442695, %v588_v8 }
 0x341   :  { %v573_v10 = vpop.xlane.xlu0 %572  ;;  %v576_v11 = vpop.xlane.xlu1 %575 }
 0x342   :  { %1367 = vpow2.f32 %v598_v9  ;;  %v589_v12 = vsub.f32 %v556_v42, %v573_v10  ;;  %v590_v13 = vsub.f32 %v557_v47, %v576_v11  ;;  %v1038_v9 = vld [vmem:[#allocation9 + $0x18] sm:$0xff]  ;;  %v1037_v10 = vld [vmem:[#allocation9 + $0x10] sm:$0xff] }
 0x343   :  { %1338 = vmatprep.subr.mxu0 %v1038_v9 }
 0x344   :  { %v600_v14 = vmul.f32 1.442695, %v589_v12  ;;  %v602_v17 = vmul.f32 1.442695, %v590_v13  ;;  %1339 = vmatpush3.msra.mxu0 %v1038_v9  ;;  %v1036_v12 = vld [vmem:[#allocation9 + $0x8] sm:$0xff] }
 0x345   :  { %v579_v18 = vpop.xlane.xlu0 %578  ;;  %v582_v19 = vpop.xlane.xlu1 %581  ;;  %1340 = vmatprep.subr.mxu0 %v1037_v10 }
 0x346   :  { %1369 = vpow2.f32 %v600_v14  ;;  %v591_v20 = vsub.f32 %v558_v53, %v579_v18  ;;  %v592_v21 = vsub.f32 %v559_v54, %v582_v19  ;;  %1341 = vmatpush3.msra.mxu0 %v1037_v10  ;;  %v1035_v14 = vld [vmem:[#allocation9] sm:$0xff] }
 0x347   :  { %1371 = vpow2.f32 %v602_v17  ;;  %1342 = vmatprep.subr.mxu0 %v1036_v12 }
 0x348   :  { %v604_v22 = vmul.f32 1.442695, %v591_v20  ;;  %v606_v23 = vmul.f32 1.442695, %v592_v21  ;;  %1343 = vmatpush3.msra.mxu0 %v1036_v12 }
 0x349   :  { %v585_v24 = vpop.xlane.xlu0 %584  ;;  %v653_v25 = vpop.permute.xlu1 %652  ;;  %1344 = vmatprep.subr.mxu0 %v1035_v14 }
 0x34a   :  { %1373 = vpow2.f32 %v604_v22  ;;  %v593_v26 = vsub.f32 %v560_v57, %v585_v24  ;;  %1310 = vmatprep.subr.mxu1 %v653_v25  ;;  %1345 = vmatpush3.msra.mxu0 %v1035_v14 }
 0x34b   :  { %1375 = vpow2.f32 %v606_v23  ;;  %1311 = vmatpush3.msra.mxu1 %v653_v25 }
 0x34c   :  { %v608_v27 = vmul.f32 1.442695, %v593_v26 }
 0x34d   :  { %v651_v28 = vpop.permute.xlu0 %650  ;;  %v740_v30 = vpop.permute.xlu1 %739 }
 0x34e   :  { %1377 = vpow2.f32 %v608_v27  ;;  %1312 = vmatprep.subr.mxu1 %v651_v28 }
 0x34f   :  { %v1368_v29 = vpop.eup %1367  ;;  %1313 = vmatpush3.msra.mxu1 %v651_v28 }
 0x350   :  { %1317 = vmatprep.subr.mxu1 %v740_v30  ;;  %v616_v31 = vsel %vm561_vm2, %v1368_v29, 0.0 }
 0x351   :  { %617 = vadd.xlane.f32.xlu1 %v616_v31  ;;  %v738_v42 = vpop.permute.xlu1 %737  ;;  %v827_v43 = vpop.permute.xlu0 %826 }
 0x353   :  { %v1370_v32 = vpop.eup %1369 }
 0x354   :  { %v1372_v33 = vpop.eup %1371  ;;  %v619_v34 = vsel %vm561_vm2, %v1370_v32, 0.0 }
 0x355   :  { %620 = vadd.xlane.f32.xlu0 %v619_v34  ;;  %v622_v35 = vsel %vm561_vm2, %v1372_v33, 0.0  ;;  %v825_v44 = vpop.permute.xlu1 %824 }
 0x356   :  { %623 = vadd.xlane.f32.xlu1 %v622_v35 }
 0x357   :  { %v1374_v36 = vpop.eup %1373 }
 0x358   :  { %v1376_v37 = vpop.eup %1375  ;;  %v625_v38 = vsel %vm561_vm2, %v1374_v36, 0.0 }
 0x359   :  { %626 = vadd.xlane.f32.xlu0 %v625_v38  ;;  %v628_v39 = vsel %vm561_vm2, %v1376_v37, 0.0 }
 0x35a   :  { %629 = vadd.xlane.f32.xlu1 %v628_v39 }
 0x35b   :  { %v1378_v40 = vpop.eup %1377 }
 0x35c   :  { %v631_v41 = vsel %vm561_vm2, %v1378_v40, 0.0 }
 0x35d   :  { %632 = vadd.xlane.f32.xlu0 %v631_v41 }
 0x36b   :  { %911 = vrot.lane.b32.xlu1 %v1628_v15, %s1517_s28 }
 0x373   :  { %913 = vrot.lane.b32.xlu0 %v1630_v16, %s1517_s28 }
 0x382   :  { %v615_v45 = vpop.xlane.xlu0 %614 }
 0x383   :  { %1379 = vrcp.f32 %v615_v45 }
 0x386   :  { %v612_v46 = vpop.xlane.xlu1 %611 }
 0x387   :  { %1381 = vrcp.f32 %v612_v46 }
 0x390   :  { %v1380_v47 = vpop.eup %1379 }
 0x391   :  { %v643_v50 = vmul.f32 %v1380_v47, %v1683_v1 }
 0x394   :  { %v1382_v48 = vpop.eup %1381 }
 0x395   :  { %v642_v49 = vmul.f32 %v1382_v48, %v1687_v4 }
 0x397   :  { %1314 = vmatprep.mubr.msk.f32.mxu1 %vm561_vm2, %v642_v49 }
 0x398   :  { %1315 = vmatmul.mubr.msk.f32.vlgmr.msra.gmra.mxu1 %vm561_vm2, %v643_v50 }
 0x399   :  { %1318 = vmatpush3.msra.mxu1 %v740_v30 }
 0x39a   :  { %1319 = vmatprep.subr.mxu1 %v738_v42 }
 0x39b   :  { %1320 = vmatpush3.msra.mxu1 %v738_v42 }
 0x39c   :  { %1324 = vmatprep.subr.mxu1 %v827_v43 }
 0x3da   :  { %v618_v15 = vpop.xlane.xlu1 %617 }
 0x3db   :  { %1383 = vrcp.f32 %v618_v15 }
 0x3de   :  { %v621_v16 = vpop.xlane.xlu0 %620 }
 0x3df   :  { %1385 = vrcp.f32 %v621_v16  ;;  %v624_v51 = vpop.xlane.xlu1 %623 }
 0x3e0   :  { %1387 = vrcp.f32 %v624_v51  ;;  %v1225_v51 = vld [vmem:[%s1746_s6] ss:$0 sm:$0xff] }
 0x3e2   :  { %v627_v52 = vpop.xlane.xlu0 %626 }
 0x3e3   :  { %1389 = vrcp.f32 %v627_v52  ;;  %v630_v53 = vpop.xlane.xlu1 %629 }
 0x3e4   :  { %1391 = vrcp.f32 %v630_v53  ;;  %v1226_v53 = vld [vmem:[%s1747_s7] ss:$0 sm:$0xff] }
 0x3e6   :  { %v633_v54 = vpop.xlane.xlu0 %632 }
 0x3e7   :  { %1393 = vrcp.f32 %v633_v54  ;;  %v912_v4 = vpop.permute.xlu1 %911 }
 0x3e8   :  { %v1384_v55 = vpop.eup %1383 }
 0x3e9   :  { %v644_v56 = vmul.f32 %v1384_v55, %v1368_v29  ;;  %v1222_v29 = vld [vmem:[%s1745_s5] ss:$0 sm:$0xff] }
 0x3ea   :  { %v914_v0 = vpop.permute.xlu0 %913 }
 0x3eb   :  { %1321 = vmatprep.mubr.msk.f32.mxu1 %vm561_vm2, %v644_v56 }
 0x3ec   :  { %v1386_v57 = vpop.eup %1385 }
 0x3ed   :  { %v1388_v58 = vpop.eup %1387  ;;  %v645_v59 = vmul.f32 %v1386_v57, %v1370_v32 }
 0x3ee   :  { %v646_v60 = vmul.f32 %v1388_v58, %v1372_v33 }
 0x3ef   :  { %1322 = vmatmul.mubr.msk.f32.vlgmr.msra.gmra.mxu1 %vm561_vm2, %v645_v59 }
 0x3f0   :  { %v1390_v61 = vpop.eup %1389  ;;  %1325 = vmatpush3.msra.mxu1 %v827_v43  ;;  %1328 = vmatprep.mubr.msk.f32.mxu1 %vm561_vm2, %v646_v60 }
 0x3f1   :  { %v1392_v62 = vpop.eup %1391  ;;  %1326 = vmatprep.subr.mxu1 %v825_v44  ;;  %v647_v63 = vmul.f32 %v1390_v61, %v1374_v36 }
 0x3f2   :  { %1327 = vmatpush3.msra.mxu1 %v825_v44  ;;  %v648_v1 = vmul.f32 %v1392_v62, %v1376_v37 }
 0x3f3   :  { %1331 = vmatprep.subr.mxu1 %v914_v0  ;;  %1329 = vmatmul.mubr.msk.f32.vlgmr.msra.gmra.mxu1 %vm561_vm2, %v647_v63 }
 0x3f4   :  { %v1394_v3 = vpop.eup %1393  ;;  %1332 = vmatpush3.msra.mxu1 %v914_v0  ;;  %1335 = vmatprep.mubr.msk.f32.mxu1 %vm561_vm2, %v648_v1 }
 0x3f5   :  { %1333 = vmatprep.subr.mxu1 %v912_v4  ;;  %v649_v6 = vmul.f32 %v1394_v3, %v1378_v40 }
 0x3f6   :  { %1334 = vmatpush3.msra.mxu1 %v912_v4 }
 0x3f7   :  { %1336 = vmatmul.mubr.msk.f32.vlgmr.msra.gmra.mxu1 %vm561_vm2, %v649_v6 }
 0x458   :  { %v1316_v7 = vpop.f32.mrf.mxu1 }
 0x459   :  { %999 = vst.msk [vmem:[#allocation2 + $0x8] sm:$0xff] %vm198_vm1, %v1316_v7 }
 0x45a   :  { %v728_v8 = vpop.f32.mrf.mxu1 }
 0x45b   :  { %998 = vst.msk [vmem:[#allocation2] sm:$0xff] %vm198_vm1, %v728_v8 }
 0x4af   :  { %v1323_v11 = vpop.f32.mrf.mxu1 }
 0x4b0   :  { %1004 = vrot.lane.b32.xlu1 %v1323_v11, %s1510_s11 }
 0x4b1   :  { %v815_v13 = vpop.f32.mrf.mxu1 }
 0x4b2   :  { %1002 = vrot.lane.b32.xlu0 %v815_v13, %s1510_s11 }
 0x4b3   :  { %v1330_v17 = vpop.f32.mrf.mxu1 }
 0x4b4   :  { %1015 = vrot.lane.b32.xlu1 %v1330_v17, %s1518_s29 }
 0x4b5   :  { %v902_v18 = vpop.f32.mrf.mxu1 }
 0x4b6   :  { %1013 = vrot.lane.b32.xlu0 %v902_v18, %s1518_s29 }
 0x4b7   :  { %v1337_v19 = vpop.f32.mrf.mxu1 }
 0x4b8   :  { %1026 = vrot.lane.b32.xlu1 %v1337_v19, %s1519_s30 }
 0x4b9   :  { %v989_v20 = vpop.f32.mrf.mxu1 }
 0x4ba   :  { %1024 = vrot.lane.b32.xlu0 %v989_v20, %s1519_s30 }
 0x522   :  { %v1005_v21 = vpop.permute.xlu1 %1004 }
 0x523   :  { %1010 = vst.msk [vmem:[#allocation2 + $0x8] sm:$0xff] %vm1008_vm3, %v1005_v21 }
 0x524   :  { %v1003_v22 = vpop.permute.xlu0 %1002 }
 0x525   :  { %1009 = vst.msk [vmem:[#allocation2] sm:$0xff] %vm1008_vm3, %v1003_v22 }
 0x526   :  { %v1016_v23 = vpop.permute.xlu1 %1015 }
 0x527   :  { %1021 = vst.msk [vmem:[#allocation2 + $0x8] sm:$0xff] %vm1019_vm4, %v1016_v23 }
 0x528   :  { %v1014_v24 = vpop.permute.xlu0 %1013 }
 0x529   :  { %1020 = vst.msk [vmem:[#allocation2] sm:$0xff] %vm1019_vm4, %v1014_v24 }
 0x52a   :  { %v1027_v25 = vpop.permute.xlu1 %1026 }
 0x52b   :  { %1032 = vst.msk [vmem:[#allocation2 + $0x8] sm:$0xff] %vm1030_vm5, %v1027_v25 }
 0x52c   :  { %v1025_v26 = vpop.permute.xlu0 %1024 }
 0x52d   :  { %1031 = vst.msk [vmem:[#allocation2] sm:$0xff] %vm1030_vm5, %v1025_v26 }
 0x532   :  { %v1034_v28 = vld [vmem:[#allocation2 + $0x8] sm:$0xff] }
 0x534   :  { %v1033_v27 = vld [vmem:[#allocation2] sm:$0xff] }
 0x535   :  { %1346 = vmatprep.mubr.msk.f32.mxu0 %vm98_vm0, %v1033_v27 }
 0x536   :  { %1347 = vmatmul.mubr.msk.f32.vlgmr.msra.gmra.mxu0 %vm98_vm0, %v1034_v28 }
 0x5f6   :  { %v1348_v30 = vpop.f32.mrf.mxu0 }
 0x5f7   :  { %v1124_v31 = vadd.f32 %v1348_v30, %v1222_v29 }
 0x5f8   :  { %v1118_v32 = vpop.f32.mrf.mxu0 }
 0x5f9   :  { %v1119_v33 = vadd.f32 %v1222_v29, %v1118_v32  ;;  %v1128_v34 = vadd.f32 %v1124_v31, %v1594_v5 }
 0x5fb   :  { %v1132_v35 = vsel %vm98_vm0, %v1128_v34, 0.0  ;;  %v1127_v36 = vadd.f32 %v1119_v33, %v1590_v2 }
 0x5fc   :  { %1133 = vadd.xlane.f32.xlu1 %v1132_v35 }
 0x5fd   :  { %v1129_v37 = vsel %vm98_vm0, %v1127_v36, 0.0 }
 0x5fe   :  { %1130 = vadd.xlane.f32.xlu0 %v1129_v37 }
 0x685   :  { %v1134_v38 = vpop.xlane.xlu1 %1133 }
 0x686   :  { %v1137_v39 = vmul.f32 0.03125, %v1134_v38 }
 0x687   :  { %v1131_v40 = vpop.xlane.xlu0 %1130 }
 0x688   :  { %v1136_v41 = vmul.f32 0.03125, %v1131_v40  ;;  %v1139_v42 = vsub.f32 %v1128_v34, %v1137_v39 }
 0x68a   :  { %v1138_v43 = vsub.f32 %v1127_v36, %v1136_v41  ;;  %v1141_v46 = vmul.f32 %v1139_v42, %v1139_v42 }
 0x68c   :  { %v1140_v44 = vmul.f32 %v1138_v43, %v1138_v43  ;;  %v1145_v5 = vsel %vm98_vm0, %v1141_v46, 0.0 }
 0x68e   :  { %v1142_v45 = vsel %vm98_vm0, %v1140_v44, 0.0 }
 0x68f   :  { %1143 = vadd.xlane.f32.xlu0 %v1142_v45 }
 0x693   :  { %1146 = vadd.xlane.f32.xlu0 %v1145_v5 }
 0x718   :  { %v1144_v47 = vpop.xlane.xlu0 %1143 }
 0x719   :  { %v1148_v2 = vmul.f32 0.03125, %v1144_v47 }
 0x71b   :  { %v1150_v48 = vadd.f32 1e-12, %v1148_v2 }
 0x71c   :  { %v1147_v49 = vpop.xlane.xlu0 %1146 }
 0x71d   :  { %1395 = vrsqrt.f32 %v1150_v48  ;;  %v1149_v50 = vmul.f32 0.03125, %v1147_v49 }
 0x71f   :  { %v1151_v15 = vadd.f32 1e-12, %v1149_v50 }
 0x721   :  { %1397 = vrsqrt.f32 %v1151_v15 }
 0x72a   :  { %v1396_v16 = vpop.eup %1395 }
 0x72b   :  { %v1154_v52 = vmul.f32 %v1396_v16, %v1138_v43 }
 0x72d   :  { %v1163_v54 = vmul.f32 %v1225_v51, %v1154_v52 }
 0x72e   :  { %v1398_v55 = vpop.eup %1397 }
 0x72f   :  { %v1155_v56 = vmul.f32 %v1398_v55, %v1139_v42  ;;  %v1172_v57 = vadd.f32 %v1226_v53, %v1163_v54 }
 0x731   :  { %v1164_v58 = vmul.f32 %v1225_v51, %v1155_v56  ;;  %1174 = vst.msk [vmem:[#allocation11] sm:$0xff] %vm98_vm0, %v1172_v57 }
 0x733   :  { %v1173_v59 = vadd.f32 %v1226_v53, %v1164_v58 }
 0x735   :  { %1175 = vst.msk [vmem:[#allocation11 + $0x8] sm:$0xff] %vm98_vm0, %v1173_v59 }
 0x736   :  { %1490 = shalt.err (!%p1487_p10)
}
 0x737   :  { %1187 = dma.vmem_to_hbm [thread:$0]  %s1182_s17, 256, %s1748_s8, [#allocation5], %s1509_s10, %s1509_s10, %s1510_s11  }
 0x738   :  { %1505 = dma.done.wait [#allocation5], 256  }
 0x739   :  { %1506 = vsyncadd [#allocation5], 4294967040 }
 0x73a   :  { %1191 = vsyncpa [#allocation4], 1 }
 0x73b   :  { %1192 = vsyncpa [#allocation7], 1 }
 0x73c   :  { %1193 = vsyncpa [#allocation10], 1 }
 0x73d   :  { %1194 = vsyncpa [#allocation5], 1 }

</bundles_post_ra>
